<compile_context>
chip_gen: v7x
topology: tpu7x:2x2x1
jax: 0.10.0
libtpu: 0.0.40
codegen_flags: <defaults>
</compile_context>

<pallas_src>
import functools

import jax
import jax.numpy as jnp
from jax.experimental import pallas as pl
from jax.experimental.pallas import tpu as pltpu


def _round_up(x, m):
    return ((x + m - 1) // m) * m


def line_loss_kernel(v1_ref, ctx_ref, sel_ref, out_ref, *, b_total, tile_b, n_terms):
    """One batch tile: partial sum of softplus(-pos) + sum_k softplus(neg_k)."""
    t = pl.program_id(0)

    v1 = v1_ref[...].astype(jnp.float32)                 # [TB, D]
    ctx = ctx_ref[...].astype(jnp.float32)                # [TB, (NEG+1)*D]
    sel = sel_ref[...]                                     # [(NEG+1)*D, NEG+1]

    # Replicate v1 across the NEG+1 lane chunks (cheap lane copies).
    v1_rep = jnp.concatenate([v1] * n_terms, axis=1)       # [TB, (NEG+1)*D]
    prod = v1_rep * ctx                                    # [TB, (NEG+1)*D]

    # Block-diagonal +/-1 matrix routes the D-reduction through the MXU and
    # bakes in the sign of the positive term:
    #   scores[:, 0]   = -<v1, v2>        (positive sample)
    #   scores[:, k+1] =  <v1, c_jk>      (negative samples)
    scores = jnp.dot(prod, sel, preferred_element_type=jnp.float32)  # [TB, NEG+1]

    # One batched softplus over all NEG+1 terms: softplus(x) = -logsigmoid(-x).
    per_row = jnp.sum(jnp.logaddexp(0.0, scores), axis=1, keepdims=True)  # [TB, 1]

    # Mask zero-padded rows of the last tile so they don't contribute.
    row_ids = jax.lax.broadcasted_iota(jnp.int32, (tile_b, 1), 0) + t * tile_b
    per_row = jnp.where(row_ids < b_total, per_row, 0.0)

    # Lane/sublane-dense (1, 8, 128) output block; wrapper reads [:, 0, 0].
    out_ref[...] = jnp.full(out_ref.shape, jnp.sum(per_row), jnp.float32)


def line_forward(vertex_emb, context_emb, u, i, js, *, tile_b=1024):
    """Embedding gathers in XLA + tiled Pallas kernel for the loss."""
    B = u.shape[0]
    NEG = js.shape[1]
    D = vertex_emb.shape[1]
    n_terms = NEG + 1

    # Tile size: multiple of 8 sublanes, capped at tile_b; pad B up to it.
    tb = min(tile_b, _round_up(B, 8))
    b_pad = _round_up(B, tb)
    num_tiles = b_pad // tb

    # Pad the tiny int32 index arrays (NOT the gathered [B, NEG, D] tensor);
    # padded rows gather row 0 (valid, finite) and are masked in-kernel.
    if b_pad != B:
        pad = b_pad - B
        u = jnp.pad(u, ((0, pad),))
        i = jnp.pad(i, ((0, pad),))
        js = jnp.pad(js, ((0, pad), (0, 0)))

    # Single combined gather for positive + negative context rows, flattened
    # to a lane-dense [B_pad, (NEG+1)*D] layout (row-major reshape is free).
    idx = jnp.concatenate([i[:, None], js], axis=1)            # [B_pad, NEG+1]
    v1 = jnp.take(vertex_emb, u, axis=0)                       # [B_pad, D]
    ctx = jnp.take(context_emb, idx, axis=0).reshape(b_pad, n_terms * D)

    # Block-diagonal selection/sign matrix (constant, ~5 KB, DMA'd once).
    r = jnp.arange(n_terms * D)[:, None]
    c = jnp.arange(n_terms)[None, :]
    sel = jnp.where((r // D) == c, jnp.where(c == 0, -1.0, 1.0), 0.0)
    sel = sel.astype(jnp.float32)                              # [(NEG+1)*D, NEG+1]

    kernel = functools.partial(
        line_loss_kernel, b_total=B, tile_b=tb, n_terms=n_terms)

    partials = pl.pallas_call(
        kernel,
        out_shape=jax.ShapeDtypeStruct((num_tiles, 8, 128), jnp.float32),
        grid_spec=pltpu.PrefetchScalarGridSpec(
            num_scalar_prefetch=0,
            grid=(num_tiles,),
            in_specs=[
                pl.BlockSpec((tb, D), lambda b: (b, 0)),
                pl.BlockSpec((tb, n_terms * D), lambda b: (b, 0)),
                pl.BlockSpec((n_terms * D, n_terms), lambda b: (0, 0)),
            ],
            out_specs=pl.BlockSpec((1, 8, 128), lambda b: (b, 0, 0)),
        ),
        compiler_params=pltpu.CompilerParams(
            dimension_semantics=("parallel",),
            vmem_limit_bytes=32 * 1024 * 1024,   # tiny footprint; safe on v7x's 64 MiB
        ),
    )(v1, ctx, sel)

    # Per-tile partials -> mean over the TRUE batch size.
    return jnp.sum(partials[:, 0, 0]) / B


def _reference_loss(vertex_emb, context_emb, u, i, js):
    """Pure-JAX replica of the PyTorch forward (for correctness checks)."""
    dim = vertex_emb.shape[1]
    v1 = jnp.take(vertex_emb, u, axis=0)
    v2 = jnp.take(context_emb, i, axis=0)
    negs = -jnp.take(context_emb, js, axis=0)
    pos = jax.nn.log_sigmoid(jnp.sum(v1 * v2, axis=1))
    negb = jnp.sum(
        jax.nn.log_sigmoid(jnp.sum(v1.reshape(v1.shape[0], 1, dim) * negs, axis=2)),
        axis=1,
    )
    return -jnp.mean(pos + negb)


if __name__ == "__main__":
    # Small synthetic config consistent with line.__init__ / forward.
    user_size = 16
    item_size = 16
    size = user_size + item_size
    dim = 32
    batch = 8
    neg = 5

    key = jax.random.PRNGKey(0)
    k_v, k_c, k_u, k_i, k_j, k_u2, k_i2, k_j2 = jax.random.split(key, 8)

    # nn.Embedding weights: uniform(-0.5, 0.5) / dim  (deterministic init)
    vertex_emb = (jax.random.uniform(k_v, (size, dim), jnp.float32,
                                     minval=-0.5, maxval=0.5) / dim)
    context_emb = (jax.random.uniform(k_c, (size, dim), jnp.float32,
                                      minval=-0.5, maxval=0.5) / dim)

    # Case 1: single tile (batch == tile).
    u = jax.random.randint(k_u, (batch,), 0, size, dtype=jnp.int32)
    i = jax.random.randint(k_i, (batch,), 0, size, dtype=jnp.int32)
    js = jax.random.randint(k_j, (batch, neg), 0, size, dtype=jnp.int32)

    loss = line_forward(vertex_emb, context_emb, u, i, js)
    jax.block_until_ready(loss)
    ref = _reference_loss(vertex_emb, context_emb, u, i, js)
    assert jnp.allclose(loss, ref, atol=1e-5, rtol=1e-5), (loss, ref)

    # Case 2: multiple tiles + ragged last tile (exercises index padding / masking).
    batch2 = 20
    u2 = jax.random.randint(k_u2, (batch2,), 0, size, dtype=jnp.int32)
    i2 = jax.random.randint(k_i2, (batch2,), 0, size, dtype=jnp.int32)
    js2 = jax.random.randint(k_j2, (batch2, neg), 0, size, dtype=jnp.int32)

    loss2 = line_forward(vertex_emb, context_emb, u2, i2, js2, tile_b=8)
    jax.block_until_ready(loss2)
    ref2 = _reference_loss(vertex_emb, context_emb, u2, i2, js2)
    assert jnp.allclose(loss2, ref2, atol=1e-5, rtol=1e-5), (loss2, ref2)

    print("KERNEL_OK")
</pallas_src>

<mosaic_0001>
module attributes {stable_mosaic.version = 11 : i64} {
  func.func @line_loss_kernel(%arg0: i32, %arg1: memref<8x32xf32, #tpu.memory_space<vmem>>, %arg2: memref<8x192xf32, #tpu.memory_space<vmem>>, %arg3: memref<192x6xf32, #tpu.memory_space<vmem>>, %arg4: memref<1x8x128xf32, #tpu.memory_space<vmem>>) attributes {dimension_semantics = [#tpu.dimension_semantics<parallel>], iteration_bounds = array<i64: 1>, scalar_prefetch = 0 : i64, scratch_operands = 0 : i64, tpu.core_type = #tpu.core_type<tc>, window_params = [{transform_indices = @transform_0, window_bounds = array<i64: 8, 32>}, {transform_indices = @transform_1, window_bounds = array<i64: 8, 192>}, {pipeline_mode = #tpu.pipeline_mode<synchronous>, transform_indices = @transform_2, window_bounds = array<i64: 192, 6>}, {transform_indices = @transform_3, window_bounds = array<i64: 1, 8, 128>}]} {
    %c0 = arith.constant 0 : index
    %c0_0 = arith.constant 0 : index
    %0 = vector.load %arg1[%c0, %c0_0] : memref<8x32xf32, #tpu.memory_space<vmem>>, vector<8x32xf32>
    %c0_1 = arith.constant 0 : index
    %c0_2 = arith.constant 0 : index
    %1 = vector.load %arg2[%c0_1, %c0_2] : memref<8x192xf32, #tpu.memory_space<vmem>>, vector<8x192xf32>
    %c0_3 = arith.constant 0 : index
    %c0_4 = arith.constant 0 : index
    %2 = vector.load %arg3[%c0_3, %c0_4] : memref<192x6xf32, #tpu.memory_space<vmem>>, vector<192x6xf32>
    %3 = tpu.concatenate %0, %0, %0, %0, %0, %0 in 1 : vector<8x32xf32>, vector<8x32xf32>, vector<8x32xf32>, vector<8x32xf32>, vector<8x32xf32>, vector<8x32xf32> -> vector<8x192xf32>
    %4 = arith.mulf %3, %1 : vector<8x192xf32>
    %cst = arith.constant dense<0.000000e+00> : vector<8x6xf32>
    %5 = tpu.matmul %4, %2, %cst {dimension_numbers = #tpu.dot_dimension_numbers<[1], [0], [0], [1], [0, 0, 1, 1], [], []>} : vector<8x192xf32>, vector<192x6xf32>, vector<8x6xf32> -> vector<8x6xf32>
    %cst_5 = arith.constant 0.000000e+00 : f32
    %6 = vector.broadcast %cst_5 : f32 to vector<8x6xf32>
    %7 = arith.maximumf %6, %5 : vector<8x6xf32>
    %8 = vector.broadcast %cst_5 : f32 to vector<8x6xf32>
    %9 = arith.subf %8, %5 : vector<8x6xf32>
    %10 = arith.cmpf one, %9, %9 : vector<8x6xf32>
    %11 = vector.broadcast %cst_5 : f32 to vector<8x6xf32>
    %12 = arith.addf %11, %5 : vector<8x6xf32>
    %13 = math.absf %9 : vector<8x6xf32>
    %cst_6 = arith.constant 0.000000e+00 : f32
    %14 = vector.broadcast %cst_6 : f32 to vector<8x6xf32>
    %15 = arith.subf %14, %13 : vector<8x6xf32>
    %16 = math.exp %15 : vector<8x6xf32>
    %17 = math.log1p %16 : vector<8x6xf32>
    %18 = arith.addf %7, %17 : vector<8x6xf32>
    %19 = arith.select %10, %12, %18 : vector<8x6xi1>, vector<8x6xf32>
    %cst_7 = arith.constant dense<0.000000e+00> : vector<8xf32>
    %20 = vector.multi_reduction <add>, %19, %cst_7 [1] : vector<8x6xf32> to vector<8xf32>
    %21 = vector.shape_cast %20 : vector<8xf32> to vector<8x1xf32>
    %22 = tpu.iota {dimensions = array<i32: 0>} : vector<8x1xi32>
    %c8_i32 = arith.constant 8 : i32
    %23 = arith.muli %arg0, %c8_i32 : i32
    %24 = vector.broadcast %23 : i32 to vector<8x1xi32>
    %25 = arith.addi %22, %24 : vector<8x1xi32>
    %c8_i32_8 = arith.constant 8 : i32
    %26 = vector.broadcast %c8_i32_8 : i32 to vector<8x1xi32>
    %27 = arith.cmpi slt, %25, %26 : vector<8x1xi32>
    %cst_9 = arith.constant 0.000000e+00 : f32
    %28 = vector.broadcast %cst_9 : f32 to vector<8x1xf32>
    %29 = arith.select %27, %21, %28 : vector<8x1xi1>, vector<8x1xf32>
    %30 = vector.shape_cast %29 : vector<8x1xf32> to vector<1x8x1xf32>
    %cst_10 = arith.constant dense<0.000000e+00> : vector<1xf32>
    %31 = vector.multi_reduction <add>, %30, %cst_10 [1, 2] : vector<1x8x1xf32> to vector<1xf32>
    %32 = vector.shape_cast %31 : vector<1xf32> to vector<1x1x1xf32>
    %33 = vector.extract %32[0, 0, 0] : f32 from vector<1x1x1xf32>
    %34 = vector.broadcast %33 : f32 to vector<1x8x128xf32>
    %c0_11 = arith.constant 0 : index
    %c0_12 = arith.constant 0 : index
    %c0_13 = arith.constant 0 : index
    %35 = vector.load %arg4[%c0_11, %c0_12, %c0_13] : memref<1x8x128xf32, #tpu.memory_space<vmem>>, vector<1x8x128xf32>
    tpu.vector_store %arg4[%c0_11, %c0_12, %c0_13], %34 {strides = array<i32>} : memref<1x8x128xf32, #tpu.memory_space<vmem>>, vector<1x8x128xf32>,
    return
  }
  func.func @transform_0(%arg0: i32) -> (i32, i32) {
    %c0_i32 = arith.constant 0 : i32
    %c0_i32_0 = arith.constant 0 : i32
    return %arg0, %c0_i32 : i32, i32
  }
  func.func @transform_1(%arg0: i32) -> (i32, i32) {
    %c0_i32 = arith.constant 0 : i32
    %c0_i32_0 = arith.constant 0 : i32
    return %arg0, %c0_i32 : i32, i32
  }
  func.func @transform_2(%arg0: i32) -> (i32, i32) {
    %c0_i32 = arith.constant 0 : i32
    %c0_i32_0 = arith.constant 0 : i32
    %c0_i32_1 = arith.constant 0 : i32
    return %c0_i32, %c0_i32_0 : i32, i32
  }
  func.func @transform_3(%arg0: i32) -> (i32, i32, i32) {
    %c0_i32 = arith.constant 0 : i32
    %c0_i32_0 = arith.constant 0 : i32
    %c0_i32_1 = arith.constant 0 : i32
    return %arg0, %c0_i32, %c0_i32_0 : i32, i32, i32
  }
}

</mosaic_0001>

<bundles_post_ra>
// kernel: tpu_custom_call.1
= control target key start
LH: loop header
LB: loop body
LE: loop exit
PB: predicated region body
PF: predicated region fallthrough
CT: control target
= control target key end

     0   :  { %s262_s18 = smov 32   ;;  %v263_v3 = vmov 0.0|0.0   ;;  %s264_s22 = smov 96   ;;  %s386_s0 = inlined_call_operand.vmem [shape: f32[8,32], index: 0, kind: input, shape index: {}]   ;;  %s387_s1 = inlined_call_operand.vmem [shape: f32[8,192], index: 1, kind: input, shape index: {}]   ;;  %s388_s2 = inlined_call_operand.vmem [shape: f32[192,6], index: 2, kind: input, shape index: {}]   ;;  %s389_s3 = inlined_call_operand.hbm [shape: f32[1,8,128], index: 3, kind: output, shape index: {}]  }
   0x1   :  { %v290_v0 = vld [vmem:[%s386_s0] sm:$0xff]  ;;  %v19_v2 = vld [vmem:[%s388_s2 + $0x8] sm:$0xff]  ;;  %191 = vmatprep.subr.bf16.mxu0 %v263_v3  ;;  %v20_v5 = vld [vmem:[%s388_s2 + $0x10] sm:$0xff]  ;;  %s265_s27 = smov 64  }
   0x2   :  { %v18_v1 = vld [vmem:[%s388_s2] sm:$0xff]  ;;  %43 = vrot.lane.b32.xlu0 %v290_v0, %s262_s18  ;;  %v21_v6 = vld [vmem:[%s388_s2 + $0x18] sm:$0xff]  ;;  %49 = vrot.lane.b32.xlu1 %v290_v0, %s264_s22 }
   0x3   :  { %v192_v4 = vpack.c.bf16 %v19_v2, %v18_v1  ;;  %v195_v7 = vpack.c.bf16 %v21_v6, %v20_v5  ;;  %v22_v8 = vld [vmem:[%s388_s2 + $0x20] sm:$0xff]  ;;  %v23_v9 = vld [vmem:[%s388_s2 + $0x28] sm:$0xff]  ;;  %v24_v11 = vld [vmem:[%s388_s2 + $0x30] sm:$0xff] }
   0x4   :  { %v198_v10 = vpack.c.bf16 %v23_v9, %v22_v8  ;;  %v25_v12 = vld [vmem:[%s388_s2 + $0x38] sm:$0xff] }
   0x5   :  { %193 = vmatpush1.bf16.msra.mxu0 %v192_v4 }
   0x6   :  { %194 = vmatprep.subr.bf16.mxu0 %v263_v3  ;;  %46 = vrot.lane.b32.xlu0 %v290_v0, %s265_s27 }
   0x9   :  { %196 = vmatpush1.bf16.msra.mxu0 %v195_v7 }
   0xa   :  { %197 = vmatprep.subr.bf16.mxu0 %v263_v3 }
   0xb   :  { %8 = vsyncpa [#allocation3], 0  ;;  %v201_v13 = vpack.c.bf16 %v25_v12, %v24_v11  ;;  %v26_v14 = vld [vmem:[%s388_s2 + $0x40] sm:$0xff]  ;;  %v27_v15 = vld [vmem:[%s388_s2 + $0x48] sm:$0xff]  ;;  %vm52_vm0 = vcmask 261120   ;;  %vm54_vm1 = vcmask 523264  }
   0xc   :  { %v204_v16 = vpack.c.bf16 %v27_v15, %v26_v14  ;;  %v28_v17 = vld [vmem:[%s388_s2 + $0x50] sm:$0xff]  ;;  %v29_v18 = vld [vmem:[%s388_s2 + $0x58] sm:$0xff]  ;;  %v30_v20 = vld [vmem:[%s388_s2 + $0x60] sm:$0xff]  ;;  %vm56_vm2 = vcmask 785408   ;;  %vm152_vm4 = vcmask 48128   ;;  %vm163_vm6 = vcmask 7168  }
   0xd   :  { %199 = vmatpush1.bf16.msra.mxu0 %v198_v10  ;;  %v207_v19 = vpack.c.bf16 %v29_v18, %v28_v17  ;;  %v31_v21 = vld [vmem:[%s388_s2 + $0x68] sm:$0xff]  ;;  %v32_v23 = vld [vmem:[%s388_s2 + $0x70] sm:$0xff]  ;;  %v33_v24 = vld [vmem:[%s388_s2 + $0x78] sm:$0xff] }
   0xe   :  { %200 = vmatprep.subr.bf16.mxu0 %v263_v3  ;;  %v210_v22 = vpack.c.bf16 %v31_v21, %v30_v20  ;;  %v213_v25 = vpack.c.bf16 %v33_v24, %v32_v23  ;;  %v34_v26 = vld [vmem:[%s388_s2 + $0x80] sm:$0xff]  ;;  %v35_v27 = vld [vmem:[%s388_s2 + $0x88] sm:$0xff]  ;;  %v36_v29 = vld [vmem:[%s388_s2 + $0x90] sm:$0xff] }
   0xf   :  { %v216_v28 = vpack.c.bf16 %v35_v27, %v34_v26  ;;  %v37_v30 = vld [vmem:[%s388_s2 + $0x98] sm:$0xff]  ;;  %v38_v32 = vld [vmem:[%s388_s2 + $0xa0] sm:$0xff]  ;;  %v39_v33 = vld [vmem:[%s388_s2 + $0xa8] sm:$0xff] }
  0x10   :  { %v219_v31 = vpack.c.bf16 %v37_v30, %v36_v29  ;;  %v222_v34 = vpack.c.bf16 %v39_v33, %v38_v32  ;;  %v40_v35 = vld [vmem:[%s388_s2 + $0xb0] sm:$0xff]  ;;  %v41_v36 = vld [vmem:[%s388_s2 + $0xb8] sm:$0xff]  ;;  %v17_v38 = vld [vmem:[%s387_s1 + $0x8] sm:$0xff] }
  0x11   :  { %202 = vmatpush1.bf16.msra.mxu0 %v201_v13  ;;  %v225_v37 = vpack.c.bf16 %v41_v36, %v40_v35  ;;  %v16_v44 = vld [vmem:[%s387_s1] sm:$0xff]  ;;  %s266_s1 = smov [#allocation2]  }
  0x12   :  { %203 = vmatprep.subr.bf16.mxu0 %v263_v3  ;;  %s182_s12 = sshll.u32 %s266_s1, 4  ;;  %s183_s12 = int_to_ptr.vmem [resolvable:$true] %s182_s12 }
  0x13   :  { %s238_s14 = scalar_lea.vmem %s183_s12, 128  ;;  %p243_p1 = scmp.lt.s32.totalorder %s183_s12, %s183_s12 }
  0x14   :  { %p239_p0 = scmp.ne.s32.totalorder %s183_s12, %s238_s14  ;;  %p244_p2 = scmp.lt.s32.totalorder %s238_s14, %s238_s14 }
  0x15   :  { %205 = vmatpush1.bf16.msra.mxu0 %v204_v16 }
  0x16   :  { %206 = vmatprep.subr.bf16.mxu0 %v263_v3  ;;  %p245_p3 = por %p244_p2, %p243_p1 }
  0x18   :  { %p246_p4 = pnand %p245_p3, %p239_p0 }
  0x19   :  { %208 = vmatpush1.bf16.msra.mxu0 %v207_v19 }
  0x1a   :  { %209 = vmatprep.subr.bf16.mxu0 %v263_v3 }
  0x1d   :  { %211 = vmatpush1.bf16.msra.mxu0 %v210_v22 }
  0x1e   :  { %212 = vmatprep.subr.bf16.mxu0 %v263_v3 }
  0x21   :  { %214 = vmatpush1.bf16.msra.mxu0 %v213_v25 }
  0x22   :  { %215 = vmatprep.subr.bf16.mxu0 %v263_v3 }
  0x25   :  { %217 = vmatpush1.bf16.msra.mxu0 %v216_v28 }
  0x26   :  { %218 = vmatprep.subr.bf16.mxu0 %v263_v3 }
  0x29   :  { %220 = vmatpush1.bf16.msra.mxu0 %v219_v31 }
  0x2a   :  { %221 = vmatprep.subr.bf16.mxu0 %v263_v3 }
  0x2d   :  { %223 = vmatpush1.bf16.msra.mxu0 %v222_v34 }
  0x2e   :  { %224 = vmatprep.subr.bf16.mxu0 %v263_v3 }
  0x31   :  { %226 = vmatpush1.bf16.msra.mxu0 %v225_v37 }
  0x74   :  { %v44_v39 = vpop.permute.xlu0 %43  ;;  %v50_v42 = vpop.permute.xlu1 %49 }
  0x75   :  { %v53_v40 = vsel %vm52_vm0, %v290_v0, %v44_v39 }
  0x76   :  { %v59_v41 = vmul.f32 %v53_v40, %v17_v38 }
  0x78   :  { %190 = vmatprep.mubr.msk.f32.mxu0 %vm54_vm1, %v59_v41  ;;  %v47_v43 = vpop.permute.xlu0 %46 }
  0x79   :  { %v55_v45 = vsel %vm54_vm1, %v53_v40, %v47_v43 }
  0x7a   :  { %v57_v46 = vsel %vm56_vm2, %v55_v45, %v50_v42 }
  0x7b   :  { %v58_v47 = vmul.f32 %v57_v46, %v16_v44 }
  0x7d   :  { %128 = vmatmul.mubr.f32.vlgmr.msra.gmra.mrb[0].mxu0 %v58_v47 }
 0x150   :  { %v129_v48 = vpop.f32.mrb[0].mxu0 }
 0x151   :  { %v134_v49 = vsub.f32 0.0, %v129_v48  ;;  %v131_v50 = vpop.f32.mrb[1].mxu0  ;;  %v133_v62 = vmax.f32 %v129_v48, 0.0 }
 0x153   :  { %v137_v51 = vand.u32 2147483647, %v134_v49  ;;  %vm135_vm5 = vcmp.ne.f32.partialorder %v134_v49, %v134_v49 }
 0x155   :  { %v138_v52 = vsub.f32 0.0, %v137_v51 }
 0x157   :  { %v139_v53 = vmul.f32 1.442695, %v138_v52 }
 0x159   :  { %234 = vpow2.f32 %v139_v53 }
 0x163   :  { %v235_v54 = vpop.eup %234 }
 0x164   :  { %v141_v55 = vadd.f32 1.0, %v235_v54  ;;  %v144_v56 = vmul.f32 -0.5, %v235_v54  ;;  %v147_v58 = vand.u32 2147483647, %v235_v54 }
 0x166   :  { %236 = vlog2.f32 %v141_v55  ;;  %v145_v57 = vadd.f32 1.0, %v144_v56  ;;  %vm148_vm3 = vcmp.lt.f32.partialorder %v147_v58, 0.0004427343 }
 0x168   :  { %v146_v61 = vmul.f32 %v235_v54, %v145_v57 }
 0x170   :  { %v237_v59 = vpop.eup %236 }
 0x171   :  { %v143_v60 = vmul.f32 0.6931472, %v237_v59 }
 0x173   :  { %v149_v63 = vsel %vm148_vm3, %v146_v61, %v143_v60 }
 0x174   :  { %v150_v0 = vadd.f32 %v149_v63, %v133_v62 }
 0x176   :  { %v151_v1 = vsel %vm135_vm5, %v129_v48, %v150_v0 }
 0x177   :  { %v153_v2 = vsel %vm152_vm4, %v151_v1, 0.0 }
 0x178   :  { %154 = vadd.xlane.f32.xlu1 %v153_v2 }
 0x205   :  { %v155_v3 = vpop.xlane.xlu1 %154 }
 0x206   :  { %v164_v4 = vsel %vm163_vm6, %v155_v3, 0.0 }
 0x207   :  { %165 = vadd.xlane.f32.xlu0 %v164_v4 }
 0x294   :  { %v166_v5 = vpop.xlane.xlu0 %165 }
 0x295   :  { %v167_v6 = vrot.slane %v166_v5, 4 }
 0x297   :  { %v168_v7 = vadd.f32 %v167_v6, %v166_v5 }
 0x299   :  { %v169_v8 = vrot.slane %v168_v7, 2 }
 0x29b   :  { %v170_v9 = vadd.f32 %v169_v8, %v168_v7 }
 0x29d   :  { %v171_v10 = vrot.slane %v170_v9, 1 }
 0x29f   :  { %v172_v11 = vadd.f32 %v171_v10, %v170_v9 }
 0x2a1   :  { %227 = vpush %v172_v11 }
 0x2d2   :  { %s228_s13 = spop %227 }
 0x2d3   :  { %v174_v12 = vstv %s228_s13 }
 0x2d4   :  { %175 = vst [vmem:[#allocation2] sm:$0xff] %v174_v12 }
 0x2d5   :  { %249 = shalt.err (!%p246_p4)
}
 0x2d6   :  { %s250_s17 = scalar_lea.hbm %s389_s3, 128 }
 0x2d7   :  { %p251_p5 = scmp.ne.s32.totalorder %s389_s3, %s250_s17  ;;  %p254_p6 = scmp.lt.u32.totalorder %s250_s17, %s389_s3 }
 0x2d9   :  { %p256_p7 = pnand %p254_p6, %p251_p5 }
 0x2db   :  { %259 = shalt.err (!%p256_p7)
}
 0x2dc   :  { %185 = dma.vmem_to_hbm [thread:$0]  %s183_s12, 128, %s389_s3, [#allocation3]  }
 0x2dd   :  { %260 = dma.done.wait [#allocation3], 128  }
 0x2de   :  { %261 = vsyncadd [#allocation3], 4294967168 }
 0x2df   :  { %189 = vsyncpa [#allocation3], 1 }

</bundles_post_ra>
